<compile_context>
chip_gen: v7x
topology: tpu7x:2x2x1
jax: 0.10.0
libtpu: 0.0.40
codegen_flags: <defaults>
</compile_context>

<pallas_src>
import jax
import jax.numpy as jnp
from jax import lax
from jax.experimental import pallas as pl
from jax.experimental.pallas import tpu as pltpu

EPS = 1e-5


def _linear_bn_relu_kernel(x_ref, w_ref, gb_ref, o_ref, acc_ref):
    # grid = (F_steps, K_steps); axis 1 is the serial K reduction (innermost).
    k = pl.program_id(1)

    @pl.when(k == 0)
    def _():
        acc_ref[...] = jnp.zeros_like(acc_ref)

    # bf16 x bf16 -> f32 accumulate on the MXU.
    acc_ref[...] += jnp.dot(x_ref[...], w_ref[...],
                            preferred_element_type=jnp.float32)

    @pl.when(k == pl.num_programs(1) - 1)
    def _():
        z = acc_ref[...]                                        # (N, tF), f32
        inv_n = 1.0 / z.shape[0]
        # BatchNorm1d, training mode: batch mean / biased variance.
        # Two-pass (centered) variance -> robust when |mean| >> std.
        mean = jnp.sum(z, axis=0, keepdims=True) * inv_n        # (1, tF)
        centered = z - mean
        var = jnp.sum(centered * centered, axis=0, keepdims=True) * inv_n
        inv_std = lax.rsqrt(var + EPS)                          # EUP slot, ~free
        gamma = gb_ref[0:1, :]                                  # (1, tF)
        beta = gb_ref[1:2, :]                                   # (1, tF)
        scale = inv_std * gamma
        # normalize + affine + ReLU: 2 full-tile VPU passes + max.
        o_ref[...] = jnp.maximum(centered * scale + beta, 0.0).astype(o_ref.dtype)


def _round_up(x, m):
    return (x + m - 1) // m * m


def _vmem_budget_bytes():
    try:
        cap = getattr(pltpu.get_tpu_info(), "vmem_capacity_bytes", None)
    except Exception:
        cap = None
    if not cap:
        cap = 64 * 1024 * 1024            # conservative (v7x-sized) fallback
    return (cap * 3) // 4                 # leave headroom under physical VMEM


def _choose_tiles(N, K, F_pad, vmem_budget):
    # K tile: single step for small K (no padding, full-dim block is legal);
    # 512-wide reduction steps otherwise.
    if K <= 2048:
        tile_k, K_pad = K, K
    else:
        tile_k = 512
        K_pad = _round_up(K, tile_k)

    # F tile: largest 128-multiple divisor of F_pad that fits the VMEM budget
    # (double-buffered bf16 x/w tiles + f32 out tile + f32 accumulator), then
    # capped so the "parallel" F axis has >= 2 steps when F_pad allows
    # (v7x megacore sharding; ~0.35us/step overhead is negligible elsewhere).
    candidates = [t for t in range(128, min(F_pad, 2048) + 1, 128)
                  if F_pad % t == 0]

    def vmem_bytes(tf):
        return (2 * N * tile_k * 2        # x tile (bf16, double-buffered)
                + 2 * tile_k * tf * 2     # w tile (bf16, double-buffered)
                + 2 * 2 * tf * 4          # gamma/beta tile
                + 2 * N * tf * 4          # out tile (f32, double-buffered)
                + N * tf * 4)             # f32 accumulator scratch

    fitting = [t for t in candidates if vmem_bytes(t) <= vmem_budget]
    tile_f = max(fitting) if fitting else 128
    if F_pad >= 256 and F_pad // tile_f < 2:
        tile_f = max(t for t in candidates if F_pad // t >= 2)
    return tile_k, K_pad, tile_f


def linear_bn_act(x, w, gamma, beta):
    """Fused Linear -> BatchNorm1d (training batch stats) -> ReLU.

    x: (N, in_features) f32; w: (in_features, out_features) [= Linear.weight.T];
    gamma/beta: (1, out_features).  The Linear bias is a mathematical no-op
    under training-mode BatchNorm and is intentionally not an input.
    """
    N, K = x.shape
    K2, F = w.shape
    assert K == K2 and gamma.shape == (1, F) and beta.shape == (1, F)

    F_pad = _round_up(F, 128)
    vmem_budget = _vmem_budget_bytes()
    tile_k, K_pad, tile_f = _choose_tiles(N, K, F_pad, vmem_budget)

    # bf16 MXU inputs (halved weight DMA, ~2x MXU); BN math stays f32 in-kernel.
    x = x.astype(jnp.bfloat16)
    w = w.astype(jnp.bfloat16)

    # Zero K-padding only fires for large, 512-misaligned K; exact for matmul.
    if K_pad != K:
        x = jnp.pad(x, ((0, 0), (0, K_pad - K)))
        w = jnp.pad(w, ((0, K_pad - K), (0, 0)))

    # Pack gamma/beta into one operand; F-pad only if F % 128 != 0.
    # (In production, pad the parameters once at init, not per call.)
    gb = jnp.concatenate([gamma, beta], axis=0).astype(jnp.float32)  # (2, F)
    if F_pad != F:
        w = jnp.pad(w, ((0, 0), (0, F_pad - F)))
        gb = jnp.pad(gb, ((0, 0), (0, F_pad - F)))

    grid = (F_pad // tile_f, K_pad // tile_k)   # (parallel F, reduction K)

    cost = pl.CostEstimate(
        flops=2 * N * K_pad * F_pad,
        transcendentals=F_pad,                          # one rsqrt per feature
        bytes_accessed=(grid[0] * N * K_pad * 2         # x re-read per F tile
                        + K_pad * F_pad * 2             # w (bf16)
                        + 2 * F_pad * 4                 # gamma/beta
                        + N * F_pad * 4),               # output (f32)
    )

    out = pl.pallas_call(
        _linear_bn_relu_kernel,
        # TODO(synk): emit bf16 output when downstream tolerates it (halves the
        # N*F writeback DMA); kept f32 here to match the module's dtype.
        out_shape=jax.ShapeDtypeStruct((N, F_pad), jnp.float32),
        grid_spec=pltpu.PrefetchScalarGridSpec(
            num_scalar_prefetch=0,
            grid=grid,
            in_specs=[
                pl.BlockSpec((N, tile_k), lambda j, k: (0, k)),       # x
                pl.BlockSpec((tile_k, tile_f), lambda j, k: (k, j)),  # w
                pl.BlockSpec((2, tile_f), lambda j, k: (0, j)),       # gamma|beta
            ],
            out_specs=pl.BlockSpec((N, tile_f), lambda j, k: (0, j)),
            scratch_shapes=[pltpu.VMEM((N, tile_f), jnp.float32)],
        ),
        compiler_params=pltpu.CompilerParams(
            # F tiles are independent (per-feature BN over the full batch) ->
            # shard across TensorCores on v7x; K is the serial reduction.
            dimension_semantics=("parallel", "arbitrary"),
            vmem_limit_bytes=int(vmem_budget),
        ),
        cost_estimate=cost,
    )(x, w, gb)

    return out[:, :F] if F_pad != F else out


if __name__ == "__main__":
    # Small shapes implied by the module: batch N, in_features, out_features.
    N, IN_F, OUT_F = 8, 32, 64

    key = jax.random.PRNGKey(0)
    kx, kw, kb = jax.random.split(key, 3)

    x = jax.random.normal(kx, (N, IN_F), dtype=jnp.float32)

    # Deterministic synthetic params (mimics Linear's uniform fan-in init).
    bound = 1.0 / (IN_F ** 0.5)
    w = jax.random.uniform(kw, (IN_F, OUT_F), minval=-bound, maxval=bound,
                           dtype=jnp.float32)          # (in, out) = Linear.weight.T
    b = jax.random.uniform(kb, (1, OUT_F), minval=-bound, maxval=bound,
                           dtype=jnp.float32)          # only used by the references
    gamma = jnp.ones((1, OUT_F), dtype=jnp.float32)     # BatchNorm1d.weight init
    beta = jnp.zeros((1, OUT_F), dtype=jnp.float32)     # BatchNorm1d.bias init

    out = linear_bn_act(x, w, gamma, beta)
    jax.block_until_ready(out)
    assert out.shape == (N, OUT_F)

    # Reference A (tight): same bf16-cast matmul inputs the kernel's MXU sees,
    # f32 accumulation and BN, Linear bias INCLUDED -> proves the in-kernel
    # bias drop is exact under training-mode BN.
    xb = x.astype(jnp.bfloat16).astype(jnp.float32)
    wb = w.astype(jnp.bfloat16).astype(jnp.float32)
    z = xb @ wb + b
    mu = z.mean(0, keepdims=True)
    var = ((z - mu) ** 2).mean(0, keepdims=True)
    ref = jnp.maximum((z - mu) / jnp.sqrt(var + EPS) * gamma + beta, 0.0)
    assert jnp.allclose(out, ref, atol=1e-4, rtol=1e-4)

    # Reference B (loose): full-f32 PyTorch-module semantics; tolerance covers
    # the bf16 MXU input quantization.
    z32 = x @ w + b
    mu32 = z32.mean(0, keepdims=True)
    var32 = ((z32 - mu32) ** 2).mean(0, keepdims=True)
    ref32 = jnp.maximum((z32 - mu32) / jnp.sqrt(var32 + EPS) * gamma + beta, 0.0)
    assert jnp.allclose(out, ref32, atol=5e-2, rtol=5e-2)

    print("KERNEL_OK")
</pallas_src>

<mosaic_0001>
module attributes {stable_mosaic.version = 11 : i64} {
  func.func @_linear_bn_relu_kernel(%arg0: i32, %arg1: i32, %arg2: memref<8x32xbf16, #tpu.memory_space<vmem>>, %arg3: memref<32x128xbf16, #tpu.memory_space<vmem>>, %arg4: memref<2x128xf32, #tpu.memory_space<vmem>>, %arg5: memref<8x128xf32, #tpu.memory_space<vmem>>, %arg6: memref<8x128xf32, #tpu.memory_space<vmem>>) attributes {dimension_semantics = [#tpu.dimension_semantics<parallel>, #tpu.dimension_semantics<arbitrary>], iteration_bounds = array<i64: 1, 1>, scalar_prefetch = 0 : i64, scratch_operands = 1 : i64, tpu.core_type = #tpu.core_type<tc>, window_params = [{transform_indices = @transform_0, window_bounds = array<i64: 8, 32>}, {transform_indices = @transform_1, window_bounds = array<i64: 32, 128>}, {transform_indices = @transform_2, window_bounds = array<i64: 2, 128>}, {transform_indices = @transform_3, window_bounds = array<i64: 8, 128>}]} {
    %c0_i32 = arith.constant 0 : i32
    %0 = arith.cmpi eq, %arg1, %c0_i32 : i32
    %1 = arith.extui %0 : i1 to i32
    %c0_i32_0 = arith.constant 0 : i32
    %2 = arith.cmpi ne, %1, %c0_i32_0 : i32
    scf.if %2 {
      %cst_10 = arith.constant 0.000000e+00 : f32
      %12 = vector.broadcast %cst_10 : f32 to vector<8x128xf32>
      %c0_11 = arith.constant 0 : index
      %c0_12 = arith.constant 0 : index
      %13 = vector.load %arg6[%c0_11, %c0_12] : memref<8x128xf32, #tpu.memory_space<vmem>>, vector<8x128xf32>
      tpu.vector_store %arg6[%c0_11, %c0_12], %12 {strides = array<i32>} : memref<8x128xf32, #tpu.memory_space<vmem>>, vector<8x128xf32>,
    } else {
    }
    %c0 = arith.constant 0 : index
    %c0_1 = arith.constant 0 : index
    %3 = vector.load %arg6[%c0, %c0_1] : memref<8x128xf32, #tpu.memory_space<vmem>>, vector<8x128xf32>
    %c0_2 = arith.constant 0 : index
    %c0_3 = arith.constant 0 : index
    %4 = vector.load %arg2[%c0_2, %c0_3] : memref<8x32xbf16, #tpu.memory_space<vmem>>, vector<8x32xbf16>
    %c0_4 = arith.constant 0 : index
    %c0_5 = arith.constant 0 : index
    %5 = vector.load %arg3[%c0_4, %c0_5] : memref<32x128xbf16, #tpu.memory_space<vmem>>, vector<32x128xbf16>
    %cst = arith.constant dense<0.000000e+00> : vector<8x128xf32>
    %6 = tpu.matmul %4, %5, %cst {dimension_numbers = #tpu.dot_dimension_numbers<[1], [0], [0], [1], [0, 0, 1, 1], [], []>} : vector<8x32xbf16>, vector<32x128xbf16>, vector<8x128xf32> -> vector<8x128xf32>
    %7 = arith.addf %3, %6 : vector<8x128xf32>
    %c0_6 = arith.constant 0 : index
    %c0_7 = arith.constant 0 : index
    %8 = vector.load %arg6[%c0_6, %c0_7] : memref<8x128xf32, #tpu.memory_space<vmem>>, vector<8x128xf32>
    tpu.vector_store %arg6[%c0_6, %c0_7], %7 {strides = array<i32>} : memref<8x128xf32, #tpu.memory_space<vmem>>, vector<8x128xf32>,
    %c0_i32_8 = arith.constant 0 : i32
    %9 = arith.cmpi eq, %arg1, %c0_i32_8 : i32
    %10 = arith.extui %9 : i1 to i32
    %c0_i32_9 = arith.constant 0 : i32
    %11 = arith.cmpi ne, %10, %c0_i32_9 : i32
    scf.if %11 {
      %c0_10 = arith.constant 0 : index
      %c0_11 = arith.constant 0 : index
      %12 = vector.load %arg6[%c0_10, %c0_11] : memref<8x128xf32, #tpu.memory_space<vmem>>, vector<8x128xf32>
      %cst_12 = arith.constant dense<0.000000e+00> : vector<128xf32>
      %13 = vector.multi_reduction <add>, %12, %cst_12 [0] : vector<8x128xf32> to vector<128xf32>
      %14 = vector.shape_cast %13 : vector<128xf32> to vector<1x128xf32>
      %cst_13 = arith.constant 1.250000e-01 : f32
      %15 = vector.broadcast %cst_13 : f32 to vector<1x128xf32>
      %16 = arith.mulf %14, %15 : vector<1x128xf32>
      %17 = vector.broadcast %16 : vector<1x128xf32> to vector<8x128xf32>
      %18 = arith.subf %12, %17 : vector<8x128xf32>
      %19 = arith.mulf %18, %18 : vector<8x128xf32>
      %cst_14 = arith.constant dense<0.000000e+00> : vector<128xf32>
      %20 = vector.multi_reduction <add>, %19, %cst_14 [0] : vector<8x128xf32> to vector<128xf32>
      %21 = vector.shape_cast %20 : vector<128xf32> to vector<1x128xf32>
      %cst_15 = arith.constant 1.250000e-01 : f32
      %22 = vector.broadcast %cst_15 : f32 to vector<1x128xf32>
      %23 = arith.mulf %21, %22 : vector<1x128xf32>
      %cst_16 = arith.constant 9.99999974E-6 : f32
      %24 = vector.broadcast %cst_16 : f32 to vector<1x128xf32>
      %25 = arith.addf %23, %24 : vector<1x128xf32>
      %26 = math.rsqrt %25 : vector<1x128xf32>
      %c0_17 = arith.constant 0 : index
      %c0_18 = arith.constant 0 : index
      %27 = vector.load %arg4[%c0_17, %c0_18] : memref<2x128xf32, #tpu.memory_space<vmem>>, vector<1x128xf32>
      %c1 = arith.constant 1 : index
      %c0_19 = arith.constant 0 : index
      %28 = vector.load %arg4[%c1, %c0_19] : memref<2x128xf32, #tpu.memory_space<vmem>>, vector<1x128xf32>
      %29 = arith.mulf %26, %27 : vector<1x128xf32>
      %30 = vector.broadcast %29 : vector<1x128xf32> to vector<8x128xf32>
      %31 = arith.mulf %18, %30 : vector<8x128xf32>
      %32 = vector.broadcast %28 : vector<1x128xf32> to vector<8x128xf32>
      %33 = arith.addf %31, %32 : vector<8x128xf32>
      %cst_20 = arith.constant 0.000000e+00 : f32
      %34 = vector.broadcast %cst_20 : f32 to vector<8x128xf32>
      %35 = arith.maximumf %33, %34 : vector<8x128xf32>
      %c0_21 = arith.constant 0 : index
      %c0_22 = arith.constant 0 : index
      %36 = vector.load %arg5[%c0_21, %c0_22] : memref<8x128xf32, #tpu.memory_space<vmem>>, vector<8x128xf32>
      tpu.vector_store %arg5[%c0_21, %c0_22], %35 {strides = array<i32>} : memref<8x128xf32, #tpu.memory_space<vmem>>, vector<8x128xf32>,
    } else {
    }
    return
  }
  func.func @transform_0(%arg0: i32, %arg1: i32) -> (i32, i32) {
    %c0_i32 = arith.constant 0 : i32
    %c0_i32_0 = arith.constant 0 : i32
    return %c0_i32, %arg1 : i32, i32
  }
  func.func @transform_1(%arg0: i32, %arg1: i32) -> (i32, i32) {
    %c0_i32 = arith.constant 0 : i32
    return %arg1, %arg0 : i32, i32
  }
  func.func @transform_2(%arg0: i32, %arg1: i32) -> (i32, i32) {
    %c0_i32 = arith.constant 0 : i32
    %c0_i32_0 = arith.constant 0 : i32
    return %c0_i32, %arg0 : i32, i32
  }
  func.func @transform_3(%arg0: i32, %arg1: i32) -> (i32, i32) {
    %c0_i32 = arith.constant 0 : i32
    %c0_i32_0 = arith.constant 0 : i32
    return %c0_i32, %arg0 : i32, i32
  }
}

</mosaic_0001>

<bundles_post_ra>
// kernel: tpu_custom_call.1
= control target key start
LH: loop header
LB: loop body
LE: loop exit
PB: predicated region body
PF: predicated region fallthrough
CT: control target
= control target key end

     0   :  { %8 = vsyncpa [#allocation4], 0  ;;  %s338_s0 = inlined_call_operand.hbm [shape: bf16[8,32], index: 0, kind: input, shape index: {}]   ;;  %s339_s1 = inlined_call_operand.hbm [shape: bf16[32,128], index: 1, kind: input, shape index: {}]   ;;  %s340_s2 = inlined_call_operand.vmem [shape: f32[2,128], index: 2, kind: input, shape index: {}]   ;;  %s341_s3 = inlined_call_operand.hbm [shape: f32[8,128], index: 3, kind: output, shape index: {}]  }
   0x1   :  { %9 = vsyncpa [#allocation7], 0 }
   0x2   :  { %10 = vsyncpa [#allocation5], 0  ;;  %s262_s12 = smov [#allocation3]   ;;  %s263_s14 = smov [#allocation6]  }
   0x3   :  { %s17_s13 = sshll.u32 %s262_s12, 4  ;;  %s26_s15 = sshll.u32 %s263_s14, 4  ;;  %s18_s13 = int_to_ptr.vmem [resolvable:$true] %s17_s13  ;;  %s289_s15 = int_to_ptr.vmem [resolvable:$true] %s26_s15 }
   0x4   :  { %s190_s18 = scalar_lea.hbm %s338_s0, 64 }
   0x5   :  { %p191_p0 = scmp.ne.s32.totalorder %s338_s0, %s190_s18  ;;  %p194_p1 = scmp.lt.u32.totalorder %s190_s18, %s338_s0 }
   0x7   :  { %p196_p2 = pnand %p194_p1, %p191_p0 }
   0x9   :  { %199 = shalt.err (!%p196_p2)
}
   0xa   :  { %s200_s23 = scalar_lea.vmem %s18_s13, 64  ;;  %p205_p4 = scmp.lt.s32.totalorder %s18_s13, %s18_s13 }
   0xb   :  { %p201_p3 = scmp.ne.s32.totalorder %s18_s13, %s200_s23  ;;  %p206_p5 = scmp.lt.s32.totalorder %s200_s23, %s200_s23 }
   0xd   :  { %p207_p6 = por %p206_p5, %p205_p4 }
   0xf   :  { %p208_p7 = pnand %p207_p6, %p201_p3 }
  0x11   :  { %211 = shalt.err (!%p208_p7)
}
  0x12   :  { %20 = dma.hbm_to_vmem [thread:$0]  %s338_s0, 64, %s18_s13, [#allocation4]  }
  0x13   :  { %s212_s28 = scalar_lea.hbm %s339_s1, 256 }
  0x14   :  { %p213_p8 = scmp.ne.s32.totalorder %s339_s1, %s212_s28  ;;  %p216_p9 = scmp.lt.u32.totalorder %s212_s28, %s339_s1 }
  0x16   :  { %p218_p10 = pnand %p216_p9, %p213_p8 }
  0x18   :  { %221 = shalt.err (!%p218_p10)
}
  0x19   :  { %s222_s6 = scalar_lea.vmem %s289_s15, 256  ;;  %p227_p12 = scmp.lt.s32.totalorder %s289_s15, %s289_s15 }
  0x1a   :  { %p223_p11 = scmp.ne.s32.totalorder %s289_s15, %s222_s6  ;;  %p228_p13 = scmp.lt.s32.totalorder %s222_s6, %s222_s6 }
  0x1c   :  { %p229_p0 = por %p228_p13, %p227_p12 }
  0x1e   :  { %p230_p1 = pnand %p229_p0, %p223_p11 }
  0x20   :  { %233 = shalt.err (!%p230_p1)
}
  0x21   :  { %s264_s0 = smov 64   ;;  %s265_s7 = smov 4  }
  0x22   :  { %32 = dma.hbm_to_vmem [thread:$0]  %s339_s1, 256, %s289_s15, [#allocation7], %s264_s0, %s264_s0, %s265_s7  }
  0x23   :  { %256 = dma.done.wait [#allocation4], 64  }
  0x24   :  { %257 = vsyncadd [#allocation4], 4294967232 }
  0x25   :  { %258 = dma.done.wait [#allocation7], 256  }
  0x26   :  { %259 = vsyncadd [#allocation7], 4294967040  ;;  %v266_v0 = vmov 0.0   ;;  %vm267_vm0 = vmmov 0   ;;  %v186_v1 = vld [vmem:[#allocation6] sm:$0xff]   ;;  %v187_v2 = vld [vmem:[#allocation6 + $0x8] sm:$0xff]   ;;  %v136_v25 = vlaneseq }
  0x27   :  { %171 = vmatprep.subr.bf16.mxu0 %v266_v0  ;;  %175 = vmatprep.mubr.msk.bf16.mxu0 %vm267_vm0, %v266_v0  ;;  %v48_v3 = vld [vmem:[#allocation3] sm:$0xf]  ;;  %vm65_vm1 = vcmask 261120   ;;  %s268_s13 = smov [#allocation8]  }
  0x28   :  { %172 = vmatpush3.bf16.msra.mxu0 %v186_v1  ;;  %v137_v26 = vshrl.u32 %v136_v25, 7  ;;  %v133_v27 = vld [vmem:[%s340_s2] sm:$0x1]  ;;  %v167_v32 = vld [vmem:[%s340_s2 + $0x1] ss:$0 sm:$0xff]  ;;  %s154_s14 = sshll.u32 %s268_s13, 4  ;;  %s155_s14 = int_to_ptr.vmem [resolvable:$true] %s154_s14 }
  0x29   :  { %173 = vmatprep.subr.bf16.mxu0 %v266_v0  ;;  %s234_s15 = scalar_lea.vmem %s155_s14, 128  ;;  %p239_p3 = scmp.lt.s32.totalorder %s155_s14, %s155_s14 }
  0x2a   :  { %v138_v28 = vsub.s32 0, %v137_v26  ;;  %p235_p2 = scmp.ne.s32.totalorder %s155_s14, %s234_s15  ;;  %p240_p4 = scmp.lt.s32.totalorder %s234_s15, %s234_s15 }
  0x2c   :  { %174 = vmatpush3.bf16.msra.mxu0 %v187_v2  ;;  %p241_p5 = por %p240_p4, %p239_p3 }
  0x2e   :  { %p242_p6 = pnand %p241_p5, %p235_p2 }
  0x2f   :  { %176 = vmatmul.mubr.msk.bf16.vlgmr.msra.gmra.mrb[0].mxu0 %vm65_vm1, %v48_v3 }
 0x102   :  { %v103_v4 = vpop.f32.mrb[0].mxu0 }
 0x103   :  { %v115_v5 = vrot.slane %v103_v4, 4  ;;  %v177_v6 = vpop.f32.mrb[1].mxu0 }
 0x104   :  { %v106_v7 = vpop.f32.mrb[2].mxu0 }
 0x105   :  { %v116_v8 = vadd.f32 %v115_v5, %v103_v4  ;;  %v178_v9 = vpop.f32.mrb[3].mxu0 }
 0x107   :  { %v117_v10 = vrot.slane %v116_v8, 2 }
 0x109   :  { %v118_v11 = vadd.f32 %v117_v10, %v116_v8 }
 0x10b   :  { %v119_v12 = vrot.slane %v118_v11, 1 }
 0x10d   :  { %v120_v13 = vadd.f32 %v119_v12, %v118_v11 }
 0x10f   :  { %v121_v14 = vmul.f32 0.125, %v120_v13 }
 0x111   :  { %v122_v15 = vsub.f32 %v103_v4, %v121_v14 }
 0x113   :  { %v123_v16 = vmul.f32 %v122_v15, %v122_v15 }
 0x115   :  { %v124_v17 = vrot.slane %v123_v16, 4 }
 0x117   :  { %v125_v18 = vadd.f32 %v124_v17, %v123_v16 }
 0x119   :  { %v126_v19 = vrot.slane %v125_v18, 2 }
 0x11b   :  { %v127_v20 = vadd.f32 %v126_v19, %v125_v18 }
 0x11d   :  { %v128_v21 = vrot.slane %v127_v20, 1 }
 0x11f   :  { %v129_v22 = vadd.f32 %v128_v21, %v127_v20 }
 0x121   :  { %v130_v23 = vmul.f32 0.125, %v129_v22 }
 0x123   :  { %v131_v24 = vadd.f32 1e-05, %v130_v23 }
 0x125   :  { %188 = vrsqrt.f32 %v131_v24 }
 0x12f   :  { %v189_v29 = vpop.eup %188 }
 0x130   :  { %v135_v30 = vmul.f32 %v189_v29, %v133_v27 }
 0x132   :  { %v139_v31 = vrot.slane %v135_v30, %v138_v28 }
 0x134   :  { %v140_v33 = vmul.f32 %v139_v31, %v122_v15 }
 0x136   :  { %v145_v34 = vadd.f32 %v167_v32, %v140_v33 }
 0x138   :  { %v146_v35 = vmax.f32 %v145_v34, 0.0 }
 0x13a   :  { %147 = vst [vmem:[#allocation8] sm:$0xff] %v146_v35 }
 0x13b   :  { %245 = shalt.err (!%p242_p6)
}
 0x13c   :  { %s246_s18 = scalar_lea.hbm %s341_s3, 128 }
 0x13d   :  { %p247_p7 = scmp.ne.s32.totalorder %s341_s3, %s246_s18  ;;  %p250_p8 = scmp.lt.u32.totalorder %s246_s18, %s341_s3 }
 0x13f   :  { %p252_p9 = pnand %p250_p8, %p247_p7 }
 0x141   :  { %255 = shalt.err (!%p252_p9)
}
 0x142   :  { %157 = dma.vmem_to_hbm [thread:$0]  %s155_s14, 128, %s341_s3, [#allocation5]  }
 0x143   :  { %260 = dma.done.wait [#allocation5], 128  }
 0x144   :  { %261 = vsyncadd [#allocation5], 4294967168 }
 0x145   :  { %161 = vsyncpa [#allocation4], 1 }
 0x146   :  { %162 = vsyncpa [#allocation7], 1 }
 0x147   :  { %163 = vsyncpa [#allocation5], 1 }

</bundles_post_ra>
